<compile_context>
chip_gen: v6e
topology: v6e:2x2x1
jax: 0.10.0
libtpu: 0.0.40
codegen_flags: <defaults>
</compile_context>

<pallas_src>
import functools
import math

import jax
import jax.numpy as jnp
import numpy as np
from jax.experimental import pallas as pl
from jax.experimental.pallas import tpu as pltpu


def _round_up(x, m):
    return ((x + m - 1) // m) * m


# --------------------------- kernel 1: QKV projection ------------------------
def _qkv_proj_kernel(x_ref, w_ref, b_ref, q_ref, k_ref, v_ref, *, n_head, head_dim):
    x = x_ref[0]                                             # (tq, C)
    # Small static head loop (H is typically <= 16); each iteration is one
    # (tq, C) @ (C, 3*hd) MXU matmul — 3x deeper N than per-q/k/v matmuls.
    for h in range(n_head):
        r = jnp.dot(x, w_ref[h], preferred_element_type=jnp.float32) + b_ref[h]
        q_ref[0, h] = r[:, :head_dim].astype(q_ref.dtype)                # (tq, hd), pre-scaled
        k_ref[0, h] = r[:, head_dim:2 * head_dim].astype(k_ref.dtype)
        v_ref[0, h] = r[:, 2 * head_dim:].astype(v_ref.dtype)


# --------------------------- kernel 2: flash attention -----------------------
def _flash_attn_kernel(q_ref, k_ref, v_ref, o_ref, m_sc, l_sc, acc_sc, *,
                       kv_len, kv_chunk, num_chunks, exp_dtype, approx_recip):
    q = q_ref[0, 0]                                          # (tq, hd), scale folded in
    m_sc[...] = jnp.full(m_sc.shape, -jnp.inf, dtype=jnp.float32)
    l_sc[...] = jnp.zeros(l_sc.shape, dtype=jnp.float32)
    acc_sc[...] = jnp.zeros(acc_sc.shape, dtype=jnp.float32)

    needs_mask = (num_chunks * kv_chunk) != kv_len           # static (padding only)

    def chunk_body(j, carry):
        start = j * kv_chunk
        if not isinstance(start, int):
            start = pl.multiple_of(start, kv_chunk)
        k = k_ref[0, 0, pl.ds(start, kv_chunk), :]           # slice of resident K
        v = v_ref[0, 0, pl.ds(start, kv_chunk), :]           # slice of resident V
        # Contract head dim of both operands — no K transpose / relayout.
        s = jax.lax.dot_general(q, k, (((1,), (1,)), ((), ())),
                                preferred_element_type=jnp.float32)   # (tq, tkv)
        if needs_mask:
            col = start + jax.lax.broadcasted_iota(jnp.int32, s.shape, 1)
            s = jnp.where(col < kv_len, s, -jnp.inf)
        m_prev = m_sc[...]
        m_new = jnp.maximum(m_prev, jnp.max(s, axis=-1, keepdims=True))
        alpha = jnp.exp(m_prev - m_new)
        # exp in bf16 on bf16 runs (v6e/v7x EUP), f32 otherwise; stats stay f32.
        p = jnp.exp((s - m_new).astype(exp_dtype))
        l_sc[...] = alpha * l_sc[...] + jnp.sum(p.astype(jnp.float32),
                                                axis=-1, keepdims=True)
        acc_sc[...] = alpha * acc_sc[...] + jnp.dot(
            p.astype(v.dtype), v, preferred_element_type=jnp.float32)
        m_sc[...] = m_new
        return carry

    if num_chunks == 1:
        chunk_body(0, 0)
    else:
        jax.lax.fori_loop(0, num_chunks, chunk_body, 0, unroll=num_chunks <= 8)

    inv_l = pl.reciprocal(l_sc[...], approx=approx_recip)
    o_ref[0, 0] = (acc_sc[...] * inv_l).astype(o_ref.dtype)


# --------------------------- kernel 3: output projection ---------------------
def _out_proj_kernel(y_ref, w_ref, b_ref, o_ref, *, n_head):
    tq, c = o_ref.shape[1], o_ref.shape[2]
    # Fold b_proj into the accumulator init; head reduction is internalized,
    # so the (tq, C) output store is lane-dense and there is no H grid axis.
    acc = jnp.broadcast_to(b_ref[...].astype(jnp.float32), (tq, c))
    for h in range(n_head):
        acc = acc + jnp.dot(y_ref[0, h], w_ref[h],
                            preferred_element_type=jnp.float32)
    o_ref[0] = acc.astype(o_ref.dtype)


# --------------------------------- wrapper -----------------------------------
def causal_self_attention(x, w_attn, b_attn, w_proj, b_proj, n_head):
    """x: (B,T,C); w_attn: (C,3C) [in,out]; b_attn: (3C,); w_proj: (C,C); b_proj: (C,)."""
    B, T, C = x.shape
    H = n_head
    assert C % H == 0
    hd = C // H
    scale = 1.0 / math.sqrt(hd)
    dtype = x.dtype

    # ---- sequence tiling: pad T so every tile is (8,128)-friendly ----
    tq = min(512, _round_up(T, 8))          # big q tiles amortize grid-step cost
    t_pad = _round_up(T, tq)
    nq = t_pad // tq
    tkv = min(512, t_pad)                   # in-kernel kv chunk; divides t_pad
    n_kv = t_pad // tkv

    x_p = x if t_pad == T else jnp.pad(x, ((0, 0), (0, t_pad - T), (0, 0)))

    # ---- one-time wrapper-side weight layout (keeps kernels relayout-free) ----
    wq = (w_attn[:, 0 * C:1 * C] * scale).reshape(C, H, hd)     # scale folded in
    wk = w_attn[:, 1 * C:2 * C].reshape(C, H, hd)
    wv = w_attn[:, 2 * C:3 * C].reshape(C, H, hd)
    w_qkv = jnp.transpose(jnp.concatenate([wq, wk, wv], axis=-1),
                          (1, 0, 2)).astype(dtype)              # (H, C, 3*hd)
    bq = (b_attn[0 * C:1 * C] * scale).reshape(H, 1, hd)
    bk = b_attn[1 * C:2 * C].reshape(H, 1, hd)
    bv = b_attn[2 * C:3 * C].reshape(H, 1, hd)
    b_qkv = jnp.concatenate([bq, bk, bv], axis=-1).astype(jnp.float32)   # (H, 1, 3*hd)

    # c_proj applied per head: sum_h y_h @ w_proj[h*hd:(h+1)*hd, :] == y @ w_proj.
    w_proj_h = w_proj.reshape(H, hd, C).astype(dtype)           # free leading reshape
    b_proj_2d = b_proj.reshape(1, C).astype(jnp.float32)

    exp_dtype = jnp.bfloat16 if dtype == jnp.bfloat16 else jnp.float32
    approx_recip = dtype != jnp.float32

    def cparams(sem):
        # Explicit scoped-VMEM budget (<= physical on v5e/v6e/v7x); re-derive
        # if tiles are enlarged further.  For very large C the resident QKV
        # weight slab should instead be streamed via a K-reduction grid axis.
        return pltpu.CompilerParams(dimension_semantics=sem,
                                    vmem_limit_bytes=64 * 1024 * 1024)

    # ---- 1) QKV projection: (B, T, C) -> q, k, v in (B, H, T, hd) ----
    qkv_shape = jax.ShapeDtypeStruct((B, H, t_pad, hd), dtype)
    head_out_spec = pl.BlockSpec((1, H, tq, hd), lambda b, i: (b, 0, i, 0))
    q, k, v = pl.pallas_call(
        functools.partial(_qkv_proj_kernel, n_head=H, head_dim=hd),
        out_shape=(qkv_shape, qkv_shape, qkv_shape),
        grid_spec=pltpu.PrefetchScalarGridSpec(
            num_scalar_prefetch=0,
            grid=(B, nq),
            in_specs=[
                pl.BlockSpec((1, tq, C), lambda b, i: (b, i, 0)),       # x tile
                pl.BlockSpec((H, C, 3 * hd), lambda b, i: (0, 0, 0)),   # fused qkv weights (resident)
                pl.BlockSpec((H, 1, 3 * hd), lambda b, i: (0, 0, 0)),   # fused qkv bias
            ],
            out_specs=[head_out_spec, head_out_spec, head_out_spec],
        ),
        compiler_params=cparams(("parallel", "parallel")),
    )(x_p, w_qkv, b_qkv)

    # ---- 2) Flash attention: grid (B, H, nq); K/V resident per (b, h), ----
    # ----    kv tiles swept by an in-kernel loop (no nk grid axis).      ----
    o = pl.pallas_call(
        functools.partial(_flash_attn_kernel, kv_len=T, kv_chunk=tkv,
                          num_chunks=n_kv, exp_dtype=exp_dtype,
                          approx_recip=approx_recip),
        out_shape=jax.ShapeDtypeStruct((B, H, t_pad, hd), dtype),
        grid_spec=pltpu.PrefetchScalarGridSpec(
            num_scalar_prefetch=0,
            grid=(B, H, nq),
            in_specs=[
                pl.BlockSpec((1, 1, tq, hd), lambda b, h, i: (b, h, i, 0)),
                # K/V block index is independent of the innermost q axis ->
                # fetched from HBM once per (b, h) and reused across all q tiles.
                pl.BlockSpec((1, 1, t_pad, hd), lambda b, h, i: (b, h, 0, 0)),
                pl.BlockSpec((1, 1, t_pad, hd), lambda b, h, i: (b, h, 0, 0)),
            ],
            out_specs=pl.BlockSpec((1, 1, tq, hd),
                                   lambda b, h, i: (b, h, i, 0)),
            scratch_shapes=[
                pltpu.VMEM((tq, 1), jnp.float32),    # running max  m
                pltpu.VMEM((tq, 1), jnp.float32),    # running sum  l
                pltpu.VMEM((tq, hd), jnp.float32),   # output accumulator
            ],
        ),
        compiler_params=cparams(("parallel", "parallel", "arbitrary")),
    )(q, k, v)

    # ---- 3) Output projection: grid (B, nq); head reduction inside the kernel ----
    out = pl.pallas_call(
        functools.partial(_out_proj_kernel, n_head=H),
        out_shape=jax.ShapeDtypeStruct((B, t_pad, C), dtype),
        grid_spec=pltpu.PrefetchScalarGridSpec(
            num_scalar_prefetch=0,
            grid=(B, nq),
            in_specs=[
                pl.BlockSpec((1, H, tq, hd), lambda b, i: (b, 0, i, 0)),  # all heads of y tile
                pl.BlockSpec((H, hd, C), lambda b, i: (0, 0, 0)),         # w_proj_h (resident)
                pl.BlockSpec((1, C), lambda b, i: (0, 0)),                # b_proj
            ],
            out_specs=pl.BlockSpec((1, tq, C), lambda b, i: (b, i, 0)),
        ),
        compiler_params=cparams(("parallel", "parallel")),
    )(o, w_proj_h, b_proj_2d)

    if t_pad != T:
        out = out[:, :T, :]
    return out


# --------------------------------- reference ---------------------------------
def reference(x, w_attn, b_attn, w_proj, b_proj, n_head):
    """Pure-JAX reference mirroring the PyTorch forward (unmasked SDPA)."""
    B, T, C = x.shape
    hd = C // n_head
    qkv = x @ w_attn + b_attn                                 # (B, T, 3C)
    q, k, v = jnp.split(qkv, 3, axis=2)

    def heads(t):
        return t.reshape(B, T, n_head, hd).transpose(0, 2, 1, 3)  # (B, H, T, hd)

    q, k, v = heads(q), heads(k), heads(v)
    s = jnp.einsum("bhtd,bhsd->bhts", q, k) / math.sqrt(hd)
    p = jax.nn.softmax(s, axis=-1)
    y = jnp.einsum("bhts,bhsd->bhtd", p, v)
    y = y.transpose(0, 2, 1, 3).reshape(B, T, C)
    return y @ w_proj + b_proj


if __name__ == "__main__":
    B, T, C, n_head = 2, 8, 32, 4

    key = jax.random.PRNGKey(0)
    k_x, k_wa, k_ba, k_wp, k_bp = jax.random.split(key, 5)

    x = jax.random.normal(k_x, (B, T, C), dtype=jnp.float32)

    # nn.Linear-like init; weights stored pre-transposed as (in, out).
    bound = 1.0 / math.sqrt(C)
    w_attn = jax.random.uniform(k_wa, (C, 3 * C), minval=-bound, maxval=bound,
                                dtype=jnp.float32)
    b_attn = jax.random.uniform(k_ba, (3 * C,), minval=-bound, maxval=bound,
                                dtype=jnp.float32)
    w_proj = jax.random.uniform(k_wp, (C, C), minval=-bound, maxval=bound,
                                dtype=jnp.float32)
    b_proj = jax.random.uniform(k_bp, (C,), minval=-bound, maxval=bound,
                                dtype=jnp.float32)

    attn = jax.jit(causal_self_attention, static_argnums=(5,))
    out = jax.block_until_ready(attn(x, w_attn, b_attn, w_proj, b_proj, n_head))

    ref = reference(x, w_attn, b_attn, w_proj, b_proj, n_head)
    np.testing.assert_allclose(np.asarray(out), np.asarray(ref),
                               rtol=1e-4, atol=1e-4)

    print("KERNEL_OK")
</pallas_src>

<mosaic_0001>
module attributes {stable_mosaic.version = 11 : i64} {
  func.func @_out_proj_kernel(%arg0: i32, %arg1: i32, %arg2: memref<1x4x8x8xf32, #tpu.memory_space<vmem>>, %arg3: memref<4x8x32xf32, #tpu.memory_space<vmem>>, %arg4: memref<1x32xf32, #tpu.memory_space<vmem>>, %arg5: memref<1x8x32xf32, #tpu.memory_space<vmem>>) attributes {dimension_semantics = [#tpu.dimension_semantics<parallel>, #tpu.dimension_semantics<parallel>], iteration_bounds = array<i64: 2, 1>, scalar_prefetch = 0 : i64, scratch_operands = 0 : i64, tpu.core_type = #tpu.core_type<tc>, window_params = [{transform_indices = @transform_0, window_bounds = array<i64: 1, 4, 8, 8>}, {pipeline_mode = #tpu.pipeline_mode<synchronous>, transform_indices = @transform_1, window_bounds = array<i64: 4, 8, 32>}, {pipeline_mode = #tpu.pipeline_mode<synchronous>, transform_indices = @transform_2, window_bounds = array<i64: 1, 32>}, {transform_indices = @transform_3, window_bounds = array<i64: 1, 8, 32>}]} {
    %c0 = arith.constant 0 : index
    %c0_0 = arith.constant 0 : index
    %0 = vector.load %arg4[%c0, %c0_0] : memref<1x32xf32, #tpu.memory_space<vmem>>, vector<1x32xf32>
    %1 = vector.shape_cast %0 : vector<1x32xf32> to vector<1x32xf32>
    %2 = vector.broadcast %1 : vector<1x32xf32> to vector<8x32xf32>
    %c0_1 = arith.constant 0 : index
    %c0_2 = arith.constant 0 : index
    %c0_3 = arith.constant 0 : index
    %c0_4 = arith.constant 0 : index
    %3 = vector.load %arg2[%c0_1, %c0_2, %c0_3, %c0_4] : memref<1x4x8x8xf32, #tpu.memory_space<vmem>>, vector<1x1x8x8xf32>
    %4 = vector.shape_cast %3 : vector<1x1x8x8xf32> to vector<8x8xf32>
    %c0_5 = arith.constant 0 : index
    %c0_6 = arith.constant 0 : index
    %c0_7 = arith.constant 0 : index
    %5 = vector.load %arg3[%c0_5, %c0_6, %c0_7] : memref<4x8x32xf32, #tpu.memory_space<vmem>>, vector<1x8x32xf32>
    %6 = vector.shape_cast %5 : vector<1x8x32xf32> to vector<8x32xf32>
    %cst = arith.constant dense<0.000000e+00> : vector<8x32xf32>
    %7 = tpu.matmul %4, %6, %cst {dimension_numbers = #tpu.dot_dimension_numbers<[1], [0], [0], [1], [0, 0, 1, 1], [], []>} : vector<8x8xf32>, vector<8x32xf32>, vector<8x32xf32> -> vector<8x32xf32>
    %8 = arith.addf %2, %7 : vector<8x32xf32>
    %c0_8 = arith.constant 0 : index
    %c1 = arith.constant 1 : index
    %c0_9 = arith.constant 0 : index
    %c0_10 = arith.constant 0 : index
    %9 = vector.load %arg2[%c0_8, %c1, %c0_9, %c0_10] : memref<1x4x8x8xf32, #tpu.memory_space<vmem>>, vector<1x1x8x8xf32>
    %10 = vector.shape_cast %9 : vector<1x1x8x8xf32> to vector<8x8xf32>
    %c1_11 = arith.constant 1 : index
    %c0_12 = arith.constant 0 : index
    %c0_13 = arith.constant 0 : index
    %11 = vector.load %arg3[%c1_11, %c0_12, %c0_13] : memref<4x8x32xf32, #tpu.memory_space<vmem>>, vector<1x8x32xf32>
    %12 = vector.shape_cast %11 : vector<1x8x32xf32> to vector<8x32xf32>
    %cst_14 = arith.constant dense<0.000000e+00> : vector<8x32xf32>
    %13 = tpu.matmul %10, %12, %cst_14 {dimension_numbers = #tpu.dot_dimension_numbers<[1], [0], [0], [1], [0, 0, 1, 1], [], []>} : vector<8x8xf32>, vector<8x32xf32>, vector<8x32xf32> -> vector<8x32xf32>
    %14 = arith.addf %8, %13 : vector<8x32xf32>
    %c0_15 = arith.constant 0 : index
    %c2 = arith.constant 2 : index
    %c0_16 = arith.constant 0 : index
    %c0_17 = arith.constant 0 : index
    %15 = vector.load %arg2[%c0_15, %c2, %c0_16, %c0_17] : memref<1x4x8x8xf32, #tpu.memory_space<vmem>>, vector<1x1x8x8xf32>
    %16 = vector.shape_cast %15 : vector<1x1x8x8xf32> to vector<8x8xf32>
    %c2_18 = arith.constant 2 : index
    %c0_19 = arith.constant 0 : index
    %c0_20 = arith.constant 0 : index
    %17 = vector.load %arg3[%c2_18, %c0_19, %c0_20] : memref<4x8x32xf32, #tpu.memory_space<vmem>>, vector<1x8x32xf32>
    %18 = vector.shape_cast %17 : vector<1x8x32xf32> to vector<8x32xf32>
    %cst_21 = arith.constant dense<0.000000e+00> : vector<8x32xf32>
    %19 = tpu.matmul %16, %18, %cst_21 {dimension_numbers = #tpu.dot_dimension_numbers<[1], [0], [0], [1], [0, 0, 1, 1], [], []>} : vector<8x8xf32>, vector<8x32xf32>, vector<8x32xf32> -> vector<8x32xf32>
    %20 = arith.addf %14, %19 : vector<8x32xf32>
    %c0_22 = arith.constant 0 : index
    %c3 = arith.constant 3 : index
    %c0_23 = arith.constant 0 : index
    %c0_24 = arith.constant 0 : index
    %21 = vector.load %arg2[%c0_22, %c3, %c0_23, %c0_24] : memref<1x4x8x8xf32, #tpu.memory_space<vmem>>, vector<1x1x8x8xf32>
    %22 = vector.shape_cast %21 : vector<1x1x8x8xf32> to vector<8x8xf32>
    %c3_25 = arith.constant 3 : index
    %c0_26 = arith.constant 0 : index
    %c0_27 = arith.constant 0 : index
    %23 = vector.load %arg3[%c3_25, %c0_26, %c0_27] : memref<4x8x32xf32, #tpu.memory_space<vmem>>, vector<1x8x32xf32>
    %24 = vector.shape_cast %23 : vector<1x8x32xf32> to vector<8x32xf32>
    %cst_28 = arith.constant dense<0.000000e+00> : vector<8x32xf32>
    %25 = tpu.matmul %22, %24, %cst_28 {dimension_numbers = #tpu.dot_dimension_numbers<[1], [0], [0], [1], [0, 0, 1, 1], [], []>} : vector<8x8xf32>, vector<8x32xf32>, vector<8x32xf32> -> vector<8x32xf32>
    %26 = arith.addf %20, %25 : vector<8x32xf32>
    %c0_29 = arith.constant 0 : index
    %c0_30 = arith.constant 0 : index
    %c0_31 = arith.constant 0 : index
    %27 = vector.load %arg5[%c0_29, %c0_30, %c0_31] : memref<1x8x32xf32, #tpu.memory_space<vmem>>, vector<1x8x32xf32>
    %28 = vector.shape_cast %27 : vector<1x8x32xf32> to vector<8x32xf32>
    %29 = vector.shape_cast %26 : vector<8x32xf32> to vector<1x8x32xf32>
    tpu.vector_store %arg5[%c0_29, %c0_30, %c0_31], %29 {strides = array<i32>} : memref<1x8x32xf32, #tpu.memory_space<vmem>>, vector<1x8x32xf32>,
    return
  }
  func.func @transform_0(%arg0: i32, %arg1: i32) -> (i32, i32, i32, i32) {
    %c0_i32 = arith.constant 0 : i32
    %c0_i32_0 = arith.constant 0 : i32
    %c0_i32_1 = arith.constant 0 : i32
    return %arg0, %c0_i32, %arg1, %c0_i32_0 : i32, i32, i32, i32
  }
  func.func @transform_1(%arg0: i32, %arg1: i32) -> (i32, i32, i32) {
    %c0_i32 = arith.constant 0 : i32
    %c0_i32_0 = arith.constant 0 : i32
    %c0_i32_1 = arith.constant 0 : i32
    %c0_i32_2 = arith.constant 0 : i32
    return %c0_i32, %c0_i32_0, %c0_i32_1 : i32, i32, i32
  }
  func.func @transform_2(%arg0: i32, %arg1: i32) -> (i32, i32) {
    %c0_i32 = arith.constant 0 : i32
    %c0_i32_0 = arith.constant 0 : i32
    %c0_i32_1 = arith.constant 0 : i32
    return %c0_i32, %c0_i32_0 : i32, i32
  }
  func.func @transform_3(%arg0: i32, %arg1: i32) -> (i32, i32, i32) {
    %c0_i32 = arith.constant 0 : i32
    %c0_i32_0 = arith.constant 0 : i32
    return %arg0, %arg1, %c0_i32 : i32, i32, i32
  }
}

module attributes {stable_mosaic.version = 11 : i64} {
  func.func @_qkv_proj_kernel(%arg0: i32, %arg1: i32, %arg2: memref<1x8x32xf32, #tpu.memory_space<vmem>>, %arg3: memref<4x32x24xf32, #tpu.memory_space<vmem>>, %arg4: memref<4x1x24xf32, #tpu.memory_space<vmem>>, %arg5: memref<1x4x8x8xf32, #tpu.memory_space<vmem>>, %arg6: memref<1x4x8x8xf32, #tpu.memory_space<vmem>>, %arg7: memref<1x4x8x8xf32, #tpu.memory_space<vmem>>) attributes {dimension_semantics = [#tpu.dimension_semantics<parallel>, #tpu.dimension_semantics<parallel>], iteration_bounds = array<i64: 2, 1>, scalar_prefetch = 0 : i64, scratch_operands = 0 : i64, tpu.core_type = #tpu.core_type<tc>, window_params = [{transform_indices = @transform_0, window_bounds = array<i64: 1, 8, 32>}, {pipeline_mode = #tpu.pipeline_mode<synchronous>, transform_indices = @transform_1, window_bounds = array<i64: 4, 32, 24>}, {pipeline_mode = #tpu.pipeline_mode<synchronous>, transform_indices = @transform_2, window_bounds = array<i64: 4, 1, 24>}, {transform_indices = @transform_3, window_bounds = array<i64: 1, 4, 8, 8>}, {transform_indices = @transform_4, window_bounds = array<i64: 1, 4, 8, 8>}, {transform_indices = @transform_5, window_bounds = array<i64: 1, 4, 8, 8>}]} {
    %c0 = arith.constant 0 : index
    %c0_0 = arith.constant 0 : index
    %c0_1 = arith.constant 0 : index
    %0 = vector.load %arg2[%c0, %c0_0, %c0_1] : memref<1x8x32xf32, #tpu.memory_space<vmem>>, vector<1x8x32xf32>
    %1 = vector.shape_cast %0 : vector<1x8x32xf32> to vector<8x32xf32>
    %c0_2 = arith.constant 0 : index
    %c0_3 = arith.constant 0 : index
    %c0_4 = arith.constant 0 : index
    %2 = vector.load %arg3[%c0_2, %c0_3, %c0_4] : memref<4x32x24xf32, #tpu.memory_space<vmem>>, vector<1x32x24xf32>
    %3 = vector.shape_cast %2 : vector<1x32x24xf32> to vector<32x24xf32>
    %cst = arith.constant dense<0.000000e+00> : vector<8x24xf32>
    %4 = tpu.matmul %1, %3, %cst {dimension_numbers = #tpu.dot_dimension_numbers<[1], [0], [0], [1], [0, 0, 1, 1], [], []>} : vector<8x32xf32>, vector<32x24xf32>, vector<8x24xf32> -> vector<8x24xf32>
    %c0_5 = arith.constant 0 : index
    %c0_6 = arith.constant 0 : index
    %c0_7 = arith.constant 0 : index
    %5 = vector.load %arg4[%c0_5, %c0_6, %c0_7] : memref<4x1x24xf32, #tpu.memory_space<vmem>>, vector<1x1x24xf32>
    %6 = vector.shape_cast %5 : vector<1x1x24xf32> to vector<1x24xf32>
    %7 = vector.broadcast %6 : vector<1x24xf32> to vector<8x24xf32>
    %8 = arith.addf %4, %7 : vector<8x24xf32>
    %9 = vector.extract_strided_slice %8 {offsets = [0, 0], sizes = [8, 8], strides = [1, 1]} : vector<8x24xf32> to vector<8x8xf32>
    %c0_8 = arith.constant 0 : index
    %c0_9 = arith.constant 0 : index
    %c0_10 = arith.constant 0 : index
    %c0_11 = arith.constant 0 : index
    %10 = vector.load %arg5[%c0_8, %c0_9, %c0_10, %c0_11] : memref<1x4x8x8xf32, #tpu.memory_space<vmem>>, vector<1x1x8x8xf32>
    %11 = vector.shape_cast %10 : vector<1x1x8x8xf32> to vector<8x8xf32>
    %12 = vector.shape_cast %9 : vector<8x8xf32> to vector<1x1x8x8xf32>
    tpu.vector_store %arg5[%c0_8, %c0_9, %c0_10, %c0_11], %12 {strides = array<i32>} : memref<1x4x8x8xf32, #tpu.memory_space<vmem>>, vector<1x1x8x8xf32>,
    %13 = vector.extract_strided_slice %8 {offsets = [0, 8], sizes = [8, 8], strides = [1, 1]} : vector<8x24xf32> to vector<8x8xf32>
    %c0_12 = arith.constant 0 : index
    %c0_13 = arith.constant 0 : index
    %c0_14 = arith.constant 0 : index
    %c0_15 = arith.constant 0 : index
    %14 = vector.load %arg6[%c0_12, %c0_13, %c0_14, %c0_15] : memref<1x4x8x8xf32, #tpu.memory_space<vmem>>, vector<1x1x8x8xf32>
    %15 = vector.shape_cast %14 : vector<1x1x8x8xf32> to vector<8x8xf32>
    %16 = vector.shape_cast %13 : vector<8x8xf32> to vector<1x1x8x8xf32>
    tpu.vector_store %arg6[%c0_12, %c0_13, %c0_14, %c0_15], %16 {strides = array<i32>} : memref<1x4x8x8xf32, #tpu.memory_space<vmem>>, vector<1x1x8x8xf32>,
    %17 = vector.extract_strided_slice %8 {offsets = [0, 16], sizes = [8, 8], strides = [1, 1]} : vector<8x24xf32> to vector<8x8xf32>
    %c0_16 = arith.constant 0 : index
    %c0_17 = arith.constant 0 : index
    %c0_18 = arith.constant 0 : index
    %c0_19 = arith.constant 0 : index
    %18 = vector.load %arg7[%c0_16, %c0_17, %c0_18, %c0_19] : memref<1x4x8x8xf32, #tpu.memory_space<vmem>>, vector<1x1x8x8xf32>
    %19 = vector.shape_cast %18 : vector<1x1x8x8xf32> to vector<8x8xf32>
    %20 = vector.shape_cast %17 : vector<8x8xf32> to vector<1x1x8x8xf32>
    tpu.vector_store %arg7[%c0_16, %c0_17, %c0_18, %c0_19], %20 {strides = array<i32>} : memref<1x4x8x8xf32, #tpu.memory_space<vmem>>, vector<1x1x8x8xf32>,
    %c1 = arith.constant 1 : index
    %c0_20 = arith.constant 0 : index
    %c0_21 = arith.constant 0 : index
    %21 = vector.load %arg3[%c1, %c0_20, %c0_21] : memref<4x32x24xf32, #tpu.memory_space<vmem>>, vector<1x32x24xf32>
    %22 = vector.shape_cast %21 : vector<1x32x24xf32> to vector<32x24xf32>
    %cst_22 = arith.constant dense<0.000000e+00> : vector<8x24xf32>
    %23 = tpu.matmul %1, %22, %cst_22 {dimension_numbers = #tpu.dot_dimension_numbers<[1], [0], [0], [1], [0, 0, 1, 1], [], []>} : vector<8x32xf32>, vector<32x24xf32>, vector<8x24xf32> -> vector<8x24xf32>
    %c1_23 = arith.constant 1 : index
    %c0_24 = arith.constant 0 : index
    %c0_25 = arith.constant 0 : index
    %24 = vector.load %arg4[%c1_23, %c0_24, %c0_25] : memref<4x1x24xf32, #tpu.memory_space<vmem>>, vector<1x1x24xf32>
    %25 = vector.shape_cast %24 : vector<1x1x24xf32> to vector<1x24xf32>
    %26 = vector.broadcast %25 : vector<1x24xf32> to vector<8x24xf32>
    %27 = arith.addf %23, %26 : vector<8x24xf32>
    %28 = vector.extract_strided_slice %27 {offsets = [0, 0], sizes = [8, 8], strides = [1, 1]} : vector<8x24xf32> to vector<8x8xf32>
    %c0_26 = arith.constant 0 : index
    %c1_27 = arith.constant 1 : index
    %c0_28 = arith.constant 0 : index
    %c0_29 = arith.constant 0 : index
    %29 = vector.load %arg5[%c0_26, %c1_27, %c0_28, %c0_29] : memref<1x4x8x8xf32, #tpu.memory_space<vmem>>, vector<1x1x8x8xf32>
    %30 = vector.shape_cast %29 : vector<1x1x8x8xf32> to vector<8x8xf32>
    %31 = vector.shape_cast %28 : vector<8x8xf32> to vector<1x1x8x8xf32>
    tpu.vector_store %arg5[%c0_26, %c1_27, %c0_28, %c0_29], %31 {strides = array<i32>} : memref<1x4x8x8xf32, #tpu.memory_space<vmem>>, vector<1x1x8x8xf32>,
    %32 = vector.extract_strided_slice %27 {offsets = [0, 8], sizes = [8, 8], strides = [1, 1]} : vector<8x24xf32> to vector<8x8xf32>
    %c0_30 = arith.constant 0 : index
    %c1_31 = arith.constant 1 : index
    %c0_32 = arith.constant 0 : index
    %c0_33 = arith.constant 0 : index
    %33 = vector.load %arg6[%c0_30, %c1_31, %c0_32, %c0_33] : memref<1x4x8x8xf32, #tpu.memory_space<vmem>>, vector<1x1x8x8xf32>
    %34 = vector.shape_cast %33 : vector<1x1x8x8xf32> to vector<8x8xf32>
    %35 = vector.shape_cast %32 : vector<8x8xf32> to vector<1x1x8x8xf32>
    tpu.vector_store %arg6[%c0_30, %c1_31, %c0_32, %c0_33], %35 {strides = array<i32>} : memref<1x4x8x8xf32, #tpu.memory_space<vmem>>, vector<1x1x8x8xf32>,
    %36 = vector.extract_strided_slice %27 {offsets = [0, 16], sizes = [8, 8], strides = [1, 1]} : vector<8x24xf32> to vector<8x8xf32>
    %c0_34 = arith.constant 0 : index
    %c1_35 = arith.constant 1 : index
    %c0_36 = arith.constant 0 : index
    %c0_37 = arith.constant 0 : index
    %37 = vector.load %arg7[%c0_34, %c1_35, %c0_36, %c0_37] : memref<1x4x8x8xf32, #tpu.memory_space<vmem>>, vector<1x1x8x8xf32>
    %38 = vector.shape_cast %37 : vector<1x1x8x8xf32> to vector<8x8xf32>
    %39 = vector.shape_cast %36 : vector<8x8xf32> to vector<1x1x8x8xf32>
    tpu.vector_store %arg7[%c0_34, %c1_35, %c0_36, %c0_37], %39 {strides = array<i32>} : memref<1x4x8x8xf32, #tpu.memory_space<vmem>>, vector<1x1x8x8xf32>,
    %c2 = arith.constant 2 : index
    %c0_38 = arith.constant 0 : index
    %c0_39 = arith.constant 0 : index
    %40 = vector.load %arg3[%c2, %c0_38, %c0_39] : memref<4x32x24xf32, #tpu.memory_space<vmem>>, vector<1x32x24xf32>
    %41 = vector.shape_cast %40 : vector<1x32x24xf32> to vector<32x24xf32>
    %cst_40 = arith.constant dense<0.000000e+00> : vector<8x24xf32>
    %42 = tpu.matmul %1, %41, %cst_40 {dimension_numbers = #tpu.dot_dimension_numbers<[1], [0], [0], [1], [0, 0, 1, 1], [], []>} : vector<8x32xf32>, vector<32x24xf32>, vector<8x24xf32> -> vector<8x24xf32>
    %c2_41 = arith.constant 2 : index
    %c0_42 = arith.constant 0 : index
    %c0_43 = arith.constant 0 : index
    %43 = vector.load %arg4[%c2_41, %c0_42, %c0_43] : memref<4x1x24xf32, #tpu.memory_space<vmem>>, vector<1x1x24xf32>
    %44 = vector.shape_cast %43 : vector<1x1x24xf32> to vector<1x24xf32>
    %45 = vector.broadcast %44 : vector<1x24xf32> to vector<8x24xf32>
    %46 = arith.addf %42, %45 : vector<8x24xf32>
    %47 = vector.extract_strided_slice %46 {offsets = [0, 0], sizes = [8, 8], strides = [1, 1]} : vector<8x24xf32> to vector<8x8xf32>
    %c0_44 = arith.constant 0 : index
    %c2_45 = arith.constant 2 : index
    %c0_46 = arith.constant 0 : index
    %c0_47 = arith.constant 0 : index
    %48 = vector.load %arg5[%c0_44, %c2_45, %c0_46, %c0_47] : memref<1x4x8x8xf32, #tpu.memory_space<vmem>>, vector<1x1x8x8xf32>
    %49 = vector.shape_cast %48 : vector<1x1x8x8xf32> to vector<8x8xf32>
    %50 = vector.shape_cast %47 : vector<8x8xf32> to vector<1x1x8x8xf32>
    tpu.vector_store %arg5[%c0_44, %c2_45, %c0_46, %c0_47], %50 {strides = array<i32>} : memref<1x4x8x8xf32, #tpu.memory_space<vmem>>, vector<1x1x8x8xf32>,
    %51 = vector.extract_strided_slice %46 {offsets = [0, 8], sizes = [8, 8], strides = [1, 1]} : vector<8x24xf32> to vector<8x8xf32>
    %c0_48 = arith.constant 0 : index
    %c2_49 = arith.constant 2 : index
    %c0_50 = arith.constant 0 : index
    %c0_51 = arith.constant 0 : index
    %52 = vector.load %arg6[%c0_48, %c2_49, %c0_50, %c0_51] : memref<1x4x8x8xf32, #tpu.memory_space<vmem>>, vector<1x1x8x8xf32>
    %53 = vector.shape_cast %52 : vector<1x1x8x8xf32> to vector<8x8xf32>
    %54 = vector.shape_cast %51 : vector<8x8xf32> to vector<1x1x8x8xf32>
    tpu.vector_store %arg6[%c0_48, %c2_49, %c0_50, %c0_51], %54 {strides = array<i32>} : memref<1x4x8x8xf32, #tpu.memory_space<vmem>>, vector<1x1x8x8xf32>,
    %55 = vector.extract_strided_slice %46 {offsets = [0, 16], sizes = [8, 8], strides = [1, 1]} : vector<8x24xf32> to vector<8x8xf32>
    %c0_52 = arith.constant 0 : index
    %c2_53 = arith.constant 2 : index
    %c0_54 = arith.constant 0 : index
    %c0_55 = arith.constant 0 : index
    %56 = vector.load %arg7[%c0_52, %c2_53, %c0_54, %c0_55] : memref<1x4x8x8xf32, #tpu.memory_space<vmem>>, vector<1x1x8x8xf32>
    %57 = vector.shape_cast %56 : vector<1x1x8x8xf32> to vector<8x8xf32>
    %58 = vector.shape_cast %55 : vector<8x8xf32> to vector<1x1x8x8xf32>
    tpu.vector_store %arg7[%c0_52, %c2_53, %c0_54, %c0_55], %58 {strides = array<i32>} : memref<1x4x8x8xf32, #tpu.memory_space<vmem>>, vector<1x1x8x8xf32>,
    %c3 = arith.constant 3 : index
    %c0_56 = arith.constant 0 : index
    %c0_57 = arith.constant 0 : index
    %59 = vector.load %arg3[%c3, %c0_56, %c0_57] : memref<4x32x24xf32, #tpu.memory_space<vmem>>, vector<1x32x24xf32>
    %60 = vector.shape_cast %59 : vector<1x32x24xf32> to vector<32x24xf32>
    %cst_58 = arith.constant dense<0.000000e+00> : vector<8x24xf32>
    %61 = tpu.matmul %1, %60, %cst_58 {dimension_numbers = #tpu.dot_dimension_numbers<[1], [0], [0], [1], [0, 0, 1, 1], [], []>} : vector<8x32xf32>, vector<32x24xf32>, vector<8x24xf32> -> vector<8x24xf32>
    %c3_59 = arith.constant 3 : index
    %c0_60 = arith.constant 0 : index
    %c0_61 = arith.constant 0 : index
    %62 = vector.load %arg4[%c3_59, %c0_60, %c0_61] : memref<4x1x24xf32, #tpu.memory_space<vmem>>, vector<1x1x24xf32>
    %63 = vector.shape_cast %62 : vector<1x1x24xf32> to vector<1x24xf32>
    %64 = vector.broadcast %63 : vector<1x24xf32> to vector<8x24xf32>
    %65 = arith.addf %61, %64 : vector<8x24xf32>
    %66 = vector.extract_strided_slice %65 {offsets = [0, 0], sizes = [8, 8], strides = [1, 1]} : vector<8x24xf32> to vector<8x8xf32>
    %c0_62 = arith.constant 0 : index
    %c3_63 = arith.constant 3 : index
    %c0_64 = arith.constant 0 : index
    %c0_65 = arith.constant 0 : index
    %67 = vector.load %arg5[%c0_62, %c3_63, %c0_64, %c0_65] : memref<1x4x8x8xf32, #tpu.memory_space<vmem>>, vector<1x1x8x8xf32>
    %68 = vector.shape_cast %67 : vector<1x1x8x8xf32> to vector<8x8xf32>
    %69 = vector.shape_cast %66 : vector<8x8xf32> to vector<1x1x8x8xf32>
    tpu.vector_store %arg5[%c0_62, %c3_63, %c0_64, %c0_65], %69 {strides = array<i32>} : memref<1x4x8x8xf32, #tpu.memory_space<vmem>>, vector<1x1x8x8xf32>,
    %70 = vector.extract_strided_slice %65 {offsets = [0, 8], sizes = [8, 8], strides = [1, 1]} : vector<8x24xf32> to vector<8x8xf32>
    %c0_66 = arith.constant 0 : index
    %c3_67 = arith.constant 3 : index
    %c0_68 = arith.constant 0 : index
    %c0_69 = arith.constant 0 : index
    %71 = vector.load %arg6[%c0_66, %c3_67, %c0_68, %c0_69] : memref<1x4x8x8xf32, #tpu.memory_space<vmem>>, vector<1x1x8x8xf32>
    %72 = vector.shape_cast %71 : vector<1x1x8x8xf32> to vector<8x8xf32>
    %73 = vector.shape_cast %70 : vector<8x8xf32> to vector<1x1x8x8xf32>
    tpu.vector_store %arg6[%c0_66, %c3_67, %c0_68, %c0_69], %73 {strides = array<i32>} : memref<1x4x8x8xf32, #tpu.memory_space<vmem>>, vector<1x1x8x8xf32>,
    %74 = vector.extract_strided_slice %65 {offsets = [0, 16], sizes = [8, 8], strides = [1, 1]} : vector<8x24xf32> to vector<8x8xf32>
    %c0_70 = arith.constant 0 : index
    %c3_71 = arith.constant 3 : index
    %c0_72 = arith.constant 0 : index
    %c0_73 = arith.constant 0 : index
    %75 = vector.load %arg7[%c0_70, %c3_71, %c0_72, %c0_73] : memref<1x4x8x8xf32, #tpu.memory_space<vmem>>, vector<1x1x8x8xf32>
    %76 = vector.shape_cast %75 : vector<1x1x8x8xf32> to vector<8x8xf32>
    %77 = vector.shape_cast %74 : vector<8x8xf32> to vector<1x1x8x8xf32>
    tpu.vector_store %arg7[%c0_70, %c3_71, %c0_72, %c0_73], %77 {strides = array<i32>} : memref<1x4x8x8xf32, #tpu.memory_space<vmem>>, vector<1x1x8x8xf32>,
    return
  }
  func.func @transform_0(%arg0: i32, %arg1: i32) -> (i32, i32, i32) {
    %c0_i32 = arith.constant 0 : i32
    %c0_i32_0 = arith.constant 0 : i32
    return %arg0, %arg1, %c0_i32 : i32, i32, i32
  }
  func.func @transform_1(%arg0: i32, %arg1: i32) -> (i32, i32, i32) {
    %c0_i32 = arith.constant 0 : i32
    %c0_i32_0 = arith.constant 0 : i32
    %c0_i32_1 = arith.constant 0 : i32
    %c0_i32_2 = arith.constant 0 : i32
    return %c0_i32, %c0_i32_0, %c0_i32_1 : i32, i32, i32
  }
  func.func @transform_2(%arg0: i32, %arg1: i32) -> (i32, i32, i32) {
    %c0_i32 = arith.constant 0 : i32
    %c0_i32_0 = arith.constant 0 : i32
    %c0_i32_1 = arith.constant 0 : i32
    %c0_i32_2 = arith.constant 0 : i32
    return %c0_i32, %c0_i32_0, %c0_i32_1 : i32, i32, i32
  }
  func.func @transform_3(%arg0: i32, %arg1: i32) -> (i32, i32, i32, i32) {
    %c0_i32 = arith.constant 0 : i32
    %c0_i32_0 = arith.constant 0 : i32
    %c0_i32_1 = arith.constant 0 : i32
    return %arg0, %c0_i32, %arg1, %c0_i32_0 : i32, i32, i32, i32
  }
  func.func @transform_4(%arg0: i32, %arg1: i32) -> (i32, i32, i32, i32) {
    %c0_i32 = arith.constant 0 : i32
    %c0_i32_0 = arith.constant 0 : i32
    %c0_i32_1 = arith.constant 0 : i32
    return %arg0, %c0_i32, %arg1, %c0_i32_0 : i32, i32, i32, i32
  }
  func.func @transform_5(%arg0: i32, %arg1: i32) -> (i32, i32, i32, i32) {
    %c0_i32 = arith.constant 0 : i32
    %c0_i32_0 = arith.constant 0 : i32
    %c0_i32_1 = arith.constant 0 : i32
    return %arg0, %c0_i32, %arg1, %c0_i32_0 : i32, i32, i32, i32
  }
}

module attributes {stable_mosaic.version = 11 : i64} {
  func.func @_flash_attn_kernel(%arg0: i32, %arg1: i32, %arg2: i32, %arg3: memref<1x1x8x8xf32, #tpu.memory_space<vmem>>, %arg4: memref<1x1x8x8xf32, #tpu.memory_space<vmem>>, %arg5: memref<1x1x8x8xf32, #tpu.memory_space<vmem>>, %arg6: memref<1x1x8x8xf32, #tpu.memory_space<vmem>>, %arg7: memref<8x1xf32, #tpu.memory_space<vmem>>, %arg8: memref<8x1xf32, #tpu.memory_space<vmem>>, %arg9: memref<8x8xf32, #tpu.memory_space<vmem>>) attributes {dimension_semantics = [#tpu.dimension_semantics<parallel>, #tpu.dimension_semantics<parallel>, #tpu.dimension_semantics<arbitrary>], iteration_bounds = array<i64: 2, 4, 1>, scalar_prefetch = 0 : i64, scratch_operands = 3 : i64, tpu.core_type = #tpu.core_type<tc>, window_params = [{transform_indices = @transform_0, window_bounds = array<i64: 1, 1, 8, 8>}, {transform_indices = @transform_1, window_bounds = array<i64: 1, 1, 8, 8>}, {transform_indices = @transform_2, window_bounds = array<i64: 1, 1, 8, 8>}, {transform_indices = @transform_3, window_bounds = array<i64: 1, 1, 8, 8>}]} {
    %c0 = arith.constant 0 : index
    %c0_0 = arith.constant 0 : index
    %c0_1 = arith.constant 0 : index
    %c0_2 = arith.constant 0 : index
    %0 = vector.load %arg3[%c0, %c0_0, %c0_1, %c0_2] : memref<1x1x8x8xf32, #tpu.memory_space<vmem>>, vector<1x1x8x8xf32>
    %1 = vector.shape_cast %0 : vector<1x1x8x8xf32> to vector<8x8xf32>
    %cst = arith.constant 0xFF800000 : f32
    %2 = vector.broadcast %cst : f32 to vector<8x1xf32>
    %c0_3 = arith.constant 0 : index
    %c0_4 = arith.constant 0 : index
    %3 = vector.load %arg7[%c0_3, %c0_4] : memref<8x1xf32, #tpu.memory_space<vmem>>, vector<8x1xf32>
    tpu.vector_store %arg7[%c0_3, %c0_4], %2 {strides = array<i32>} : memref<8x1xf32, #tpu.memory_space<vmem>>, vector<8x1xf32>,
    %cst_5 = arith.constant 0.000000e+00 : f32
    %4 = vector.broadcast %cst_5 : f32 to vector<8x1xf32>
    %c0_6 = arith.constant 0 : index
    %c0_7 = arith.constant 0 : index
    %5 = vector.load %arg8[%c0_6, %c0_7] : memref<8x1xf32, #tpu.memory_space<vmem>>, vector<8x1xf32>
    tpu.vector_store %arg8[%c0_6, %c0_7], %4 {strides = array<i32>} : memref<8x1xf32, #tpu.memory_space<vmem>>, vector<8x1xf32>,
    %cst_8 = arith.constant 0.000000e+00 : f32
    %6 = vector.broadcast %cst_8 : f32 to vector<8x8xf32>
    %c0_9 = arith.constant 0 : index
    %c0_10 = arith.constant 0 : index
    %7 = vector.load %arg9[%c0_9, %c0_10] : memref<8x8xf32, #tpu.memory_space<vmem>>, vector<8x8xf32>
    tpu.vector_store %arg9[%c0_9, %c0_10], %6 {strides = array<i32>} : memref<8x8xf32, #tpu.memory_space<vmem>>, vector<8x8xf32>,
    %c0_11 = arith.constant 0 : index
    %c0_12 = arith.constant 0 : index
    %c0_13 = arith.constant 0 : index
    %c0_14 = arith.constant 0 : index
    %8 = vector.load %arg4[%c0_11, %c0_12, %c0_13, %c0_14] : memref<1x1x8x8xf32, #tpu.memory_space<vmem>>, vector<1x1x8x8xf32>
    %9 = vector.shape_cast %8 : vector<1x1x8x8xf32> to vector<8x8xf32>
    %c0_15 = arith.constant 0 : index
    %c0_16 = arith.constant 0 : index
    %c0_17 = arith.constant 0 : index
    %c0_18 = arith.constant 0 : index
    %10 = vector.load %arg5[%c0_15, %c0_16, %c0_17, %c0_18] : memref<1x1x8x8xf32, #tpu.memory_space<vmem>>, vector<1x1x8x8xf32>
    %11 = vector.shape_cast %10 : vector<1x1x8x8xf32> to vector<8x8xf32>
    %cst_19 = arith.constant dense<0.000000e+00> : vector<8x8xf32>
    %12 = tpu.matmul %1, %9, %cst_19 {dimension_numbers = #tpu.dot_dimension_numbers<[1], [1], [0], [0], [0, 0, 1, 0], [], []>} : vector<8x8xf32>, vector<8x8xf32>, vector<8x8xf32> -> vector<8x8xf32>
    %c0_20 = arith.constant 0 : index
    %c0_21 = arith.constant 0 : index
    %13 = vector.load %arg7[%c0_20, %c0_21] : memref<8x1xf32, #tpu.memory_space<vmem>>, vector<8x1xf32>
    %cst_22 = arith.constant dense<0xFF800000> : vector<8xf32>
    %14 = vector.multi_reduction <maximumf>, %12, %cst_22 [1] : vector<8x8xf32> to vector<8xf32>
    %15 = vector.shape_cast %14 : vector<8xf32> to vector<8x1xf32>
    %16 = arith.maximumf %13, %15 : vector<8x1xf32>
    %17 = arith.subf %13, %16 : vector<8x1xf32>
    %18 = math.exp %17 : vector<8x1xf32>
    %19 = vector.broadcast %16 : vector<8x1xf32> to vector<8x8xf32>
    %20 = arith.subf %12, %19 : vector<8x8xf32>
    %21 = math.exp %20 : vector<8x8xf32>
    %c0_23 = arith.constant 0 : index
    %c0_24 = arith.constant 0 : index
    %22 = vector.load %arg8[%c0_23, %c0_24] : memref<8x1xf32, #tpu.memory_space<vmem>>, vector<8x1xf32>
    %23 = arith.mulf %18, %22 : vector<8x1xf32>
    %cst_25 = arith.constant dense<0.000000e+00> : vector<8xf32>
    %24 = vector.multi_reduction <add>, %21, %cst_25 [1] : vector<8x8xf32> to vector<8xf32>
    %25 = vector.shape_cast %24 : vector<8xf32> to vector<8x1xf32>
    %26 = arith.addf %23, %25 : vector<8x1xf32>
    %c0_26 = arith.constant 0 : index
    %c0_27 = arith.constant 0 : index
    %27 = vector.load %arg8[%c0_26, %c0_27] : memref<8x1xf32, #tpu.memory_space<vmem>>, vector<8x1xf32>
    tpu.vector_store %arg8[%c0_26, %c0_27], %26 {strides = array<i32>} : memref<8x1xf32, #tpu.memory_space<vmem>>, vector<8x1xf32>,
    %c0_28 = arith.constant 0 : index
    %c0_29 = arith.constant 0 : index
    %28 = vector.load %arg9[%c0_28, %c0_29] : memref<8x8xf32, #tpu.memory_space<vmem>>, vector<8x8xf32>
    %29 = vector.broadcast %18 : vector<8x1xf32> to vector<8x8xf32>
    %30 = arith.mulf %29, %28 : vector<8x8xf32>
    %cst_30 = arith.constant dense<0.000000e+00> : vector<8x8xf32>
    %31 = tpu.matmul %21, %11, %cst_30 {dimension_numbers = #tpu.dot_dimension_numbers<[1], [0], [0], [1], [0, 0, 1, 1], [], []>} : vector<8x8xf32>, vector<8x8xf32>, vector<8x8xf32> -> vector<8x8xf32>
    %32 = arith.addf %30, %31 : vector<8x8xf32>
    %c0_31 = arith.constant 0 : index
    %c0_32 = arith.constant 0 : index
    %33 = vector.load %arg9[%c0_31, %c0_32] : memref<8x8xf32, #tpu.memory_space<vmem>>, vector<8x8xf32>
    tpu.vector_store %arg9[%c0_31, %c0_32], %32 {strides = array<i32>} : memref<8x8xf32, #tpu.memory_space<vmem>>, vector<8x8xf32>,
    %c0_33 = arith.constant 0 : index
    %c0_34 = arith.constant 0 : index
    %34 = vector.load %arg7[%c0_33, %c0_34] : memref<8x1xf32, #tpu.memory_space<vmem>>, vector<8x1xf32>
    tpu.vector_store %arg7[%c0_33, %c0_34], %16 {strides = array<i32>} : memref<8x1xf32, #tpu.memory_space<vmem>>, vector<8x1xf32>,
    %c0_35 = arith.constant 0 : index
    %c0_36 = arith.constant 0 : index
    %35 = vector.load %arg8[%c0_35, %c0_36] : memref<8x1xf32, #tpu.memory_space<vmem>>, vector<8x1xf32>
    %36 = tpu.reciprocal %35 : vector<8x1xf32> -> vector<8x1xf32>
    %c0_37 = arith.constant 0 : index
    %c0_38 = arith.constant 0 : index
    %37 = vector.load %arg9[%c0_37, %c0_38] : memref<8x8xf32, #tpu.memory_space<vmem>>, vector<8x8xf32>
    %38 = vector.broadcast %36 : vector<8x1xf32> to vector<8x8xf32>
    %39 = arith.mulf %37, %38 : vector<8x8xf32>
    %c0_39 = arith.constant 0 : index
    %c0_40 = arith.constant 0 : index
    %c0_41 = arith.constant 0 : index
    %c0_42 = arith.constant 0 : index
    %40 = vector.load %arg6[%c0_39, %c0_40, %c0_41, %c0_42] : memref<1x1x8x8xf32, #tpu.memory_space<vmem>>, vector<1x1x8x8xf32>
    %41 = vector.shape_cast %40 : vector<1x1x8x8xf32> to vector<8x8xf32>
    %42 = vector.shape_cast %39 : vector<8x8xf32> to vector<1x1x8x8xf32>
    tpu.vector_store %arg6[%c0_39, %c0_40, %c0_41, %c0_42], %42 {strides = array<i32>} : memref<1x1x8x8xf32, #tpu.memory_space<vmem>>, vector<1x1x8x8xf32>,
    return
  }
  func.func @transform_0(%arg0: i32, %arg1: i32, %arg2: i32) -> (i32, i32, i32, i32) {
    %c0_i32 = arith.constant 0 : i32
    %c0_i32_0 = arith.constant 0 : i32
    return %arg0, %arg1, %arg2, %c0_i32 : i32, i32, i32, i32
  }
  func.func @transform_1(%arg0: i32, %arg1: i32, %arg2: i32) -> (i32, i32, i32, i32) {
    %c0_i32 = arith.constant 0 : i32
    %c0_i32_0 = arith.constant 0 : i32
    %c0_i32_1 = arith.constant 0 : i32
    return %arg0, %arg1, %c0_i32, %c0_i32_0 : i32, i32, i32, i32
  }
  func.func @transform_2(%arg0: i32, %arg1: i32, %arg2: i32) -> (i32, i32, i32, i32) {
    %c0_i32 = arith.constant 0 : i32
    %c0_i32_0 = arith.constant 0 : i32
    %c0_i32_1 = arith.constant 0 : i32
    return %arg0, %arg1, %c0_i32, %c0_i32_0 : i32, i32, i32, i32
  }
  func.func @transform_3(%arg0: i32, %arg1: i32, %arg2: i32) -> (i32, i32, i32, i32) {
    %c0_i32 = arith.constant 0 : i32
    %c0_i32_0 = arith.constant 0 : i32
    return %arg0, %arg1, %arg2, %c0_i32 : i32, i32, i32, i32
  }
}

</mosaic_0001>

<bundles_post_ra>
// kernel: causal_self_attention.5
= control target key start
LH: loop header
LB: loop body
LE: loop exit
PB: predicated region body
PF: predicated region fallthrough
CT: control target
= control target key end

     0   :  { %8 = vsyncpa [#allocation3], 0  ;;  %s935_s0 = inlined_call_operand.vmem [shape: f32[2,4,8,8], index: 0, kind: input, shape index: {}]   ;;  %s936_s1 = inlined_call_operand.vmem [shape: f32[4,8,32], index: 1, kind: input, shape index: {}]   ;;  %s937_s2 = inlined_call_operand.vmem [shape: f32[1,32], index: 2, kind: input, shape index: {}]   ;;  %s938_s3 = inlined_call_operand.hbm [shape: f32[2,8,32], index: 3, kind: output, shape index: {}]  }
   0x1   :  { %10 = vsyncpa [#allocation3 + $0x1], 0  ;;  %s813_s12 = smov 0   ;;  %s815_s13 = smov 0  }
   0x2   :  { %s817_s14 = smov 0   ;;  %s819_s15 = smov 0  }
   0x3   :  { %s821_s16 = smov 0   ;;  %s823_s17 = smov 0  }
   0x4 LB: > { %s603_s18 = sadd.s32 4294967295, %s788_s17   ;;  %s604_s19 = sadd.s32 4294967294, %s788_s17   ;;  %s788_s17 = sphi %s823_s17, %s16_s17   ;;  %s784_s16 = sphi %s821_s16, %s945_s16   ;;  %s780_s15 = sphi %s819_s15, %s944_s15   ;;  %s776_s14 = sphi %s817_s14, %s943_s14   ;;  %s772_s13 = sphi %s815_s13, %s942_s13   ;;  %s768_s12 = sphi %s813_s12, %s941_s12  }
   0x5   : > { %s28_s20 = sadd.s32 1, %s784_s16  ;;  %s107_s21 = sadd.s32 1, %s776_s14 }
   0x6   : > { %p30_p0 = scmp.ge.s32.totalorder %s28_s20, 2  ;;  %p117_p1 = scmp.ne.s32.totalorder %s776_s14, %s772_s13 }
   0x7   : > { %p118_p2 = scmp.eq.s32.totalorder %s603_s18, 1  ;;  %p123_p3 = scmp.ne.s32.totalorder %s772_s13, %s768_s12 }
   0x8   : > { %s947_s20 = smov (%p30_p0, %s28_s20), 0  ;;  %p124_p5 = scmp.eq.s32.totalorder %s604_s19, 1 }
   0x9   : > { %p853_p4 = por %p118_p2, %p117_p1  ;;  %s102_s23 = ssub.s32 %s784_s16, %s947_s20 }
   0xa   : > { %p607_p6 = scmp.ge.s32.totalorder %s788_s17, 1  ;;  %p105_p7 = scmp.eq.s32.totalorder %s102_s23, 0 }
   0xb   : > { %p860_p8 = por %p124_p5, %p123_p3  ;;  %p159_p9 = scmp.lt.s32.totalorder %s788_s17, 3 }
   0xc   : > { %s866_s25 = scalar_select %p105_p7, %s776_s14, %s107_s21  }
   0xd   : > { %p160_p10 = pnand %p607_p6, %p159_p9 }
   0xe   : > { %p186_p11 = scmp.lt.s32.totalorder (!%p160_p10), %s780_s15, 1  ;;  %s183_s18 = sand.u32 (!%p160_p10), 1, %s772_s13  }
   0xf   : > { %163 = sbr.rel (%p160_p10) target bundleno = 239 (0xef), region = 32  ;;  %s608_s23 = sshll.u32 (!%p160_p10), %s183_s18, 3 }
  0x10   : > { %s623_s26 = sshll.u32 (!%p160_p10), %s780_s15, 7  ;;  %s185_s27 = scalar_lea.vmem (!%p160_p10), [#allocation2], %s608_s23 }
  0x11   : > { %s529_s28 = sshll.u32 (!%p160_p10), %s185_s27, 4  ;;  %s515_s5 = scalar_lea.sflag (!%p160_p10), [#allocation3], %s183_s18  ;;  %s530_s28 = int_to_ptr.vmem [resolvable:$true] %s529_s28 }
  0x12   : > { %s712_s6 = scalar_lea.vmem (!%p160_p10), %s530_s28, 128 }
  0x13   : > { %p713_p12 = scmp.ne.s32.totalorder (!%p160_p10), %s530_s28, %s712_s6 }
  0x14   : > { %v202_v0 = vld [vmem:[%s936_s1] sm:$0xff]  ;;  %v614_v1 = vld [vmem:[%s936_s1 + $0x8] sm:$0xff]  ;;  %v790_v2 = vmov 0.0   ;;  %vm791_vm0 = vmmov 0   ;;  %s187_s30 = scalar_select %p186_p11, %s780_s15, 1  ;;  %vm203_vm1 = vcmask 64512  }
  0x15   : > { %635 = vmatprep.subr.mxu0 %v790_v2  ;;  %640 = vmatprep.subr.mxu1 %v790_v2  ;;  %v617_v3 = vld [vmem:[%s936_s1 + $0x10] sm:$0xff]  ;;  %v620_v4 = vld [vmem:[%s936_s1 + $0x18] sm:$0xff]  ;;  %v611_v9 = vld [vmem:[%s937_s2] ss:$0 sm:$0xff]  ;;  %vm512_vm2 = vcmask 261120   ;;  %p714_p13 = pnand %p713_p12, %p853_p4  ;;  %s792_s15 = smov [#allocation2]  }
  0x16   : > { %636 = vmatpush3.msra.mxu0 %v202_v0  ;;  %637 = vmatprep.mubr.msk.f32.mxu0 %vm791_vm0, %v790_v2  ;;  %s626_s4 = sshll.u32 %s187_s30, 5 }
  0x17   : > { %641 = vmatpush3.msra.mxu1 %v614_v1  ;;  %642 = vmatprep.mubr.msk.f32.mxu1 %vm791_vm0, %v790_v2  ;;  %s193_s7 = scalar_lea.vmem %s935_s0, %s626_s4  ;;  %s527_s4 = scalar_lea.hbm %s938_s3, %s623_s26 }
  0x18   : > { %645 = vmatprep.subr.mxu0 %v790_v2  ;;  %650 = vmatprep.subr.mxu1 %v790_v2  ;;  %v201_v5 = vld [vmem:[%s193_s7] sm:$0xff]  ;;  %v613_v6 = vld [vmem:[%s193_s7 + $0x8] sm:$0xff]  ;;  %v616_v7 = vld [vmem:[%s193_s7 + $0x10] sm:$0xff]  ;;  %p715_p0 = pneg %p714_p13 }
  0x19   : > { %638 = vmatmul.mubr.msk.f32.vlgmr.msra.gmra.mxu0 %vm203_vm1, %v201_v5  ;;  %643 = vmatmul.mubr.msk.f32.vlgmr.msra.gmra.mxu1 %vm203_vm1, %v613_v6  ;;  %v619_v8 = vld [vmem:[%s193_s7 + $0x18] sm:$0xff]  ;;  %s716_s7 = sshll.u32 %s792_s15, 4  ;;  %s717_s7 = int_to_ptr.vmem [resolvable:$false] %s716_s7 }
  0x1a   : > { %646 = vmatpush3.msra.mxu0 %v617_v3  ;;  %651 = vmatpush3.msra.mxu1 %v620_v4  ;;  %s718_s8 = scalar_lea.vmem %s717_s7, 256  ;;  %p719_p1 = scmp.lt.s32.totalorder %s530_s28, %s717_s7 }
  0x1b   : > { %647 = vmatprep.mubr.msk.f32.mxu0 %vm791_vm0, %v790_v2  ;;  %652 = vmatprep.mubr.msk.f32.mxu1 %vm791_vm0, %v790_v2  ;;  %p720_p2 = scmp.lt.s32.totalorder %s718_s8, %s712_s6 }
  0x1d   : > { %648 = vmatmul.mubr.msk.f32.vlgmr.msra.gmra.mxu0 %vm203_vm1, %v616_v7  ;;  %653 = vmatmul.mubr.msk.f32.vlgmr.msra.gmra.mxu1 %vm203_vm1, %v619_v8  ;;  %p721_p3 = por %p720_p2, %p719_p1 }
  0x1f   : > { %p722_p5 = pnand %p721_p3, %p715_p0 }
  0xd9   : > { %v273_v10 = vpop.f32.mrf.mxu0  ;;  %v351_v11 = vpop.f32.mrf.mxu1 }
  0xda   : > { %v277_v12 = vadd.f32 %v611_v9, %v273_v10 }
  0xdb   : > { %v639_v13 = vpop.f32.mrf.mxu0  ;;  %v644_v14 = vpop.f32.mrf.mxu1 }
  0xdc   : > { %v355_v15 = vadd.f32 %v351_v11, %v277_v12 }
  0xdd   : > { %v429_v16 = vpop.f32.mrf.mxu0  ;;  %v507_v17 = vpop.f32.mrf.mxu1 }
  0xde   : > { %v433_v18 = vadd.f32 %v429_v16, %v355_v15 }
  0xdf   : > { %v649_v19 = vpop.f32.mrf.mxu0  ;;  %v654_v20 = vpop.f32.mrf.mxu1 }
  0xe0   : > { %v511_v21 = vadd.f32 %v507_v17, %v433_v18 }
  0xe2   : > { %513 = vst.msk [vmem:[%s185_s27] sm:$0xff] %vm512_vm2, %v511_v21 }
  0xe3   : > { %725 = shalt.err (!%p722_p5)
}
  0xe4   : > { %s726_s9 = scalar_lea.hbm %s527_s4, 128  ;;  %s730_s18 = scalar_lea.hbm %s938_s3, 256 }
  0xe5   : > { %p727_p6 = scmp.ne.s32.totalorder %s527_s4, %s726_s9  ;;  %p731_p10 = scmp.lt.s32.totalorder %s527_s4, %s938_s3 }
  0xe6   : > { %p732_p11 = scmp.lt.s32.totalorder %s730_s18, %s726_s9 }
  0xe7   : > { %p728_p7 = pnand %p727_p6, %p853_p4 }
  0xe8   : > { %p733_p12 = por %p732_p11, %p731_p10 }
  0xe9   : > { %p729_p9 = pneg %p728_p7 }
  0xeb   : > { %p734_p13 = pnand %p733_p12, %p729_p9 }
  0xed   : > { %737 = shalt.err (!%p734_p13)
}
  0xee   : > { %655 = dma.vmem_to_hbm [thread:$0]  (%p853_p4), %s530_s28, 128, %s527_s4, %s515_s5  }
  0xef PF: > { %p661_p0 = scmp.ge.s32.totalorder %s788_s17, 2  ;;  %s541_s23 = sand.u32 1, %s768_s12  }
  0xf0   : > { %s542_s26 = scalar_lea.sflag [#allocation3], %s541_s23 }
  0xf1   : > { %p658_p1 = pnand %p661_p0, %p860_p8 }
  0xf3   : > { %p659_p2 = pneg %p658_p1 }
  0xf5   : > { %763 = dma.done.wait (%p659_p2), %s542_s26, 128  }
  0xf6   : > { %765 = vsyncadd (%p659_p2), %s542_s26, 4294967168  ;;  %s16_s17 = sadd.s32 1, %s788_s17   ;;  %s941_s12 = smov %s772_s13 }
  0xf7   : > { %p13_p3 = scmp.ge.s32.totalorder %s16_s17, 4   ;;  %s942_s13 = smov %s776_s14 }
  0xf8   : > { %s943_s14 = smov %s866_s25  ;;  %s944_s15 = smov %s784_s16 }
  0xf9   : > { %s945_s16 = smov %s947_s20  ;;  %15 = sbr.rel (!%p13_p3) target bundleno = 4 (0x4), region = 73 }
  0xfe   :  { %547 = vsyncpa [#allocation3], 1 }
  0xff   :  { %549 = vsyncpa [#allocation3 + $0x1], 1 }

// kernel: causal_self_attention.3
= control target key start
LH: loop header
LB: loop body
LE: loop exit
PB: predicated region body
PF: predicated region fallthrough
CT: control target
= control target key end

     0   :  { %s1052_s18 = smov 0   ;;  %s1054_s19 = smov 0   ;;  %s1180_s0 = inlined_call_operand.vmem [shape: f32[2,8,32], index: 0, kind: input, shape index: {}]   ;;  %s1181_s1 = inlined_call_operand.vmem [shape: f32[4,32,24], index: 1, kind: input, shape index: {}]   ;;  %s1182_s2 = inlined_call_operand.vmem [shape: f32[4,1,24], index: 2, kind: input, shape index: {}]   ;;  %s1183_s3 = inlined_call_operand.vmem [shape: f32[2,4,8,8], index: 3, kind: output, shape index: {0}]   ;;  %s1184_s4 = inlined_call_operand.vmem [shape: f32[2,4,8,8], index: 4, kind: output, shape index: {1}]   ;;  %s1185_s5 = inlined_call_operand.vmem [shape: f32[2,4,8,8], index: 5, kind: output, shape index: {2}]  }
   0x1   :  { %s1056_s20 = smov 0  }
   0x2 LB: > { %s28_s21 = sadd.s32 1, %s1012_s19  ;;  %p857_p0 = scmp.ge.s32.totalorder %s1016_s20, 1  ;;  %s1016_s20 = sphi %s1056_s20, %s16_s20   ;;  %s1012_s19 = sphi %s1054_s19, %s1187_s19   ;;  %s1008_s18 = sphi %s1052_s18, %s1186_s18  }
   0x3   : > { %p30_p1 = scmp.ge.s32.totalorder %s28_s21, 2  ;;  %p214_p2 = scmp.lt.s32.totalorder %s1016_s20, 3 }
   0x5   : > { %s1189_s21 = smov (%p30_p1, %s28_s21), 0  ;;  %p215_p3 = pnand %p857_p0, %p214_p2 }
   0x6   : > { %p263_p4 = scmp.lt.s32.totalorder (!%p215_p3), %s1008_s18, 1  ;;  %s1021_s24 = smov (!%p215_p3), 112  }
   0x7   : > { %218 = sbr.rel (%p215_p3) target bundleno = 346 (0x15a), region = 32 }
   0xc   : > { %v298_v0 = vld [vmem:[%s1181_s1 + $0x18] sm:$0xff]  ;;  %v1018_v2 = vmov 0.0   ;;  %v297_v3 = vld [vmem:[%s1181_s1 + $0x10] sm:$0xff]  ;;  %s1191_s18 = smov (!%p263_p4, %s1008_s18), 1  ;;  %v296_v5 = vld [vmem:[%s1181_s1 + $0x8] sm:$0xff]  ;;  %vm306_vm0 = vcmask 261120  }
   0xd   : > { %v870_v1 = vld [vmem:[%s1181_s1 + $0x38] sm:$0xff]  ;;  %922 = vmatprep.subr.mxu0 %v1018_v2  ;;  %933 = vmatprep.subr.mxu1 %v1018_v2  ;;  %v869_v4 = vld [vmem:[%s1181_s1 + $0x30] sm:$0xff]  ;;  %v868_v6 = vld [vmem:[%s1181_s1 + $0x28] sm:$0xff]  ;;  %s858_s9 = sshll.u32 %s1191_s18, 3  ;;  %vm1019_vm1 = vmmov 0   ;;  %s1133_s12 = sshll.u32 %s1191_s18, 5 }
   0xe   : > { %923 = vmatpush3.msra.mxu0 %v298_v0  ;;  %934 = vmatpush3.msra.mxu1 %v870_v1  ;;  %v295_v7 = vld [vmem:[%s1181_s1] sm:$0xff]  ;;  %s269_s14 = scalar_lea.vmem %s1180_s0, %s858_s9  ;;  %v880_v10 = vld [vmem:[%s1181_s1 + $0x58] sm:$0xff]  ;;  %v879_v12 = vld [vmem:[%s1181_s1 + $0x50] sm:$0xff]  ;;  %s277_s23 = scalar_lea.vmem %s1183_s3, %s1133_s12  ;;  %vm380_vm2 = vcmask 64512  }
   0xf   : > { %924 = vmatprep.subr.mxu0 %v1018_v2  ;;  %935 = vmatprep.subr.mxu1 %v1018_v2  ;;  %v867_v8 = vld [vmem:[%s1181_s1 + $0x20] sm:$0xff]  ;;  %v890_v11 = vld [vmem:[%s1181_s1 + $0x78] sm:$0xff]  ;;  %v889_v13 = vld [vmem:[%s1181_s1 + $0x70] sm:$0xff]  ;;  %s1020_s18 = smov 120   ;;  %s285_s6 = scalar_lea.vmem %s1184_s4, %s1133_s12 }
  0x10   : > { %925 = vmatpush3.msra.mxu0 %v297_v3  ;;  %936 = vmatpush3.msra.mxu1 %v869_v4  ;;  %v294_v9 = vld [vmem:[%s269_s14] sm:$0xff]  ;;  %v878_v14 = vld [vmem:[%s1181_s1 + $0x48] sm:$0xff]  ;;  %s293_s9 = scalar_lea.vmem %s1185_s5, %s1133_s12 }
  0x11   : > { %926 = vmatprep.subr.mxu0 %v1018_v2  ;;  %937 = vmatprep.subr.mxu1 %v1018_v2  ;;  %v888_v15 = vld [vmem:[%s1181_s1 + $0x68] sm:$0xff]  ;;  %v877_v16 = vld [vmem:[%s1181_s1 + $0x40] sm:$0xff] }
  0x12   : > { %927 = vmatpush3.msra.mxu0 %v296_v5  ;;  %938 = vmatpush3.msra.mxu1 %v868_v6  ;;  %v887_v17 = vld [vmem:[%s1181_s1 + $0x60] sm:$0xff] }
  0x13   : > { %928 = vmatprep.subr.mxu0 %v1018_v2  ;;  %939 = vmatprep.subr.mxu1 %v1018_v2  ;;  %v865_v18 = vld [vmem:[%s1182_s2] ss:$0 sm:$0xff]  ;;  %v872_v19 = vld [vmem:[%s1182_s2 + $0x1] ss:$0 sm:$0xff]  ;;  %v882_v26 = vld [vmem:[%s1182_s2 + $0x2] ss:$0 sm:$0xff] }
  0x14   : > { %929 = vmatpush3.msra.mxu0 %v295_v7  ;;  %930 = vmatprep.mubr.msk.f32.mxu0 %vm1019_vm1, %v1018_v2  ;;  %v892_v28 = vld [vmem:[%s1182_s2 + $0x3] ss:$0 sm:$0xff] }
  0x15   : > { %940 = vmatpush3.msra.mxu1 %v867_v8  ;;  %941 = vmatprep.mubr.msk.f32.mxu1 %vm1019_vm1, %v1018_v2 }
  0x16   : > { %931 = vmatmul.mubr.msk.f32.vlgmr.msra.gmra.mxu0 %vm306_vm0, %v294_v9  ;;  %942 = vmatmul.mubr.msk.f32.vlgmr.msra.gmra.mxu1 %vm306_vm0, %v294_v9 }
  0x17   : > { %944 = vmatprep.subr.mxu0 %v1018_v2  ;;  %955 = vmatprep.subr.mxu1 %v1018_v2 }
  0x18   : > { %945 = vmatpush3.msra.mxu0 %v880_v10  ;;  %956 = vmatpush3.msra.mxu1 %v890_v11 }
  0x19   : > { %946 = vmatprep.subr.mxu0 %v1018_v2  ;;  %957 = vmatprep.subr.mxu1 %v1018_v2 }
  0x1a   : > { %947 = vmatpush3.msra.mxu0 %v879_v12  ;;  %958 = vmatpush3.msra.mxu1 %v889_v13 }
  0x1b   : > { %948 = vmatprep.subr.mxu0 %v1018_v2  ;;  %959 = vmatprep.subr.mxu1 %v1018_v2 }
  0x1c   : > { %949 = vmatpush3.msra.mxu0 %v878_v14  ;;  %952 = vmatprep.mubr.msk.f32.mxu0 %vm1019_vm1, %v1018_v2 }
  0x1d   : > { %950 = vmatprep.subr.mxu0 %v1018_v2  ;;  %960 = vmatpush3.msra.mxu1 %v888_v15 }
  0x1e   : > { %951 = vmatpush3.msra.mxu0 %v877_v16  ;;  %961 = vmatprep.subr.mxu1 %v1018_v2 }
  0x1f   : > { %953 = vmatmul.mubr.msk.f32.vlgmr.msra.gmra.mxu0 %vm306_vm0, %v294_v9  ;;  %962 = vmatpush3.msra.mxu1 %v887_v17 }
  0x20   : > { %963 = vmatprep.mubr.msk.f32.mxu1 %vm1019_vm1, %v1018_v2 }
  0x21   : > { %964 = vmatmul.mubr.msk.f32.vlgmr.msra.gmra.mxu1 %vm306_vm0, %v294_v9 }
  0xd6   : > { %v376_v20 = vpop.f32.mrf.mxu0  ;;  %v470_v21 = vpop.f32.mrf.mxu1 }
  0xd7   : > { %v377_v22 = vadd.f32 %v865_v18, %v376_v20  ;;  %v471_v23 = vadd.f32 %v872_v19, %v470_v21 }
  0xd8   : > { %v932_v24 = vpop.f32.mrf.mxu0  ;;  %v943_v25 = vpop.f32.mrf.mxu1 }
  0xd9   : > { %381 = vst.msk [vmem:[%s277_s23] sm:$0xff] %vm380_vm2, %v377_v22  ;;  %874 = vst.msk [vmem:[%s277_s23 + $0x8] sm:$0xff] %vm380_vm2, %v471_v23  ;;  %477 = vrot.lane.b32.xlu1 %v471_v23, %s1020_s18  ;;  %383 = vrot.lane.b32.xlu0 %v377_v22, %s1020_s18 }
  0xdd   : > { %482 = vrot.lane.b32.xlu1 %v471_v23, %s1021_s24  ;;  %387 = vrot.lane.b32.xlu0 %v377_v22, %s1021_s24 }
  0xdf   : > { %v566_v27 = vpop.f32.mrf.mxu0 }
  0xe0   : > { %v567_v29 = vadd.f32 %v882_v26, %v566_v27 }
  0xe1   : > { %v954_v30 = vpop.f32.mrf.mxu0  ;;  %v662_v31 = vpop.f32.mrf.mxu1 }
  0xe2   : > { %884 = vst.msk [vmem:[%s277_s23 + $0x10] sm:$0xff] %vm380_vm2, %v567_v29  ;;  %v663_v32 = vadd.f32 %v892_v28, %v662_v31  ;;  %578 = vrot.lane.b32.xlu1 %v567_v29, %s1021_s24  ;;  %573 = vrot.lane.b32.xlu0 %v567_v29, %s1020_s18 }
  0xe3   : > { %v965_v33 = vpop.f32.mrf.mxu1 }
  0xe4   : > { %894 = vst.msk [vmem:[%s277_s23 + $0x18] sm:$0xff] %vm380_vm2, %v663_v32 }
  0xe6   : > { %674 = vrot.lane.b32.xlu1 %v663_v32, %s1021_s24  ;;  %669 = vrot.lane.b32.xlu0 %v663_v32, %s1020_s18 }
 0x14b   : > { %v478_v34 = vpop.permute.xlu1 %477  ;;  %v384_v35 = vpop.permute.xlu0 %383 }
 0x14c   : > { %875 = vst.msk [vmem:[%s285_s6 + $0x8] sm:$0xff] %vm380_vm2, %v478_v34  ;;  %386 = vst.msk [vmem:[%s285_s6] sm:$0xff] %vm380_vm2, %v384_v35 }
 0x14f   : > { %v483_v36 = vpop.permute.xlu1 %482  ;;  %v388_v37 = vpop.permute.xlu0 %387 }
 0x150   : > { %876 = vst.msk [vmem:[%s293_s9 + $0x8] sm:$0xff] %vm380_vm2, %v483_v36  ;;  %390 = vst.msk [vmem:[%s293_s9] sm:$0xff] %vm380_vm2, %v388_v37 }
 0x154   : > { %v579_v38 = vpop.permute.xlu1 %578  ;;  %v574_v39 = vpop.permute.xlu0 %573 }
 0x155   : > { %886 = vst.msk [vmem:[%s293_s9 + $0x10] sm:$0xff] %vm380_vm2, %v579_v38  ;;  %885 = vst.msk [vmem:[%s285_s6 + $0x10] sm:$0xff] %vm380_vm2, %v574_v39 }
 0x158   : > { %v675_v40 = vpop.permute.xlu1 %674  ;;  %v670_v41 = vpop.permute.xlu0 %669 }
 0x159   : > { %896 = vst.msk [vmem:[%s293_s9 + $0x18] sm:$0xff] %vm380_vm2, %v675_v40  ;;  %895 = vst.msk [vmem:[%s285_s6 + $0x18] sm:$0xff] %vm380_vm2, %v670_v41 }
 0x15a PF: > { %s16_s20 = sadd.s32 1, %s1016_s20   ;;  %s1186_s18 = smov %s1012_s19 }
 0x15b   : > { %p13_p5 = scmp.ge.s32.totalorder %s16_s20, 4   ;;  %s1187_s19 = smov %s1189_s21 }
 0x15d   :  { %15 = sbr.rel (!%p13_p5) target bundleno = 2 (0x2), region = 101 }

// kernel: causal_self_attention.4
= control target key start
LH: loop header
LB: loop body
LE: loop exit
PB: predicated region body
PF: predicated region fallthrough
CT: control target
= control target key end

     0   :  { %s776_s12 = smov 0   ;;  %s778_s13 = smov 0   ;;  %s851_s0 = inlined_call_operand.vmem [shape: f32[2,4,8,8], index: 0, kind: input, shape index: {}]   ;;  %s852_s1 = inlined_call_operand.vmem [shape: f32[2,4,8,8], index: 1, kind: input, shape index: {}]   ;;  %s853_s2 = inlined_call_operand.vmem [shape: f32[2,4,8,8], index: 2, kind: input, shape index: {}]   ;;  %s854_s3 = inlined_call_operand.vmem [shape: f32[2,4,8,8], index: 3, kind: output, shape index: {}]  }
   0x1   :  { %s780_s14 = smov 0   ;;  %s782_s15 = smov 0  }
   0x2   :  { %s784_s16 = smov 0  }
   0x3 LB: > { %s28_s17 = sadd.s32 1, %s742_s14  ;;  %s32_s18 = sadd.s32 1, %s746_s15  ;;  %s750_s16 = sphi %s784_s16, %s13_s16   ;;  %s746_s15 = sphi %s782_s15, %s858_s15   ;;  %s742_s14 = sphi %s780_s14, %s857_s14   ;;  %s738_s13 = sphi %s778_s13, %s856_s13   ;;  %s734_s12 = sphi %s776_s12, %s855_s12  }
   0x4   : > { %p30_p0 = scmp.ge.s32.totalorder %s28_s17, 4  ;;  %p632_p1 = scmp.ge.s32.totalorder %s750_s16, 1 }
   0x5   : > { %p200_p2 = scmp.lt.s32.totalorder %s750_s16, 9 }
   0x6   : > { %s860_s17 = smov (%p30_p0, %s28_s17), 0  ;;  %s862_s18 = smov (!%p30_p0, %s32_s18), %s746_s15 }
   0x7   : > { %p201_p3 = pnand %p632_p1, %p200_p2  ;;  %p34_p4 = scmp.ge.s32.totalorder %s862_s18, 2 }
   0x8   : > { %p252_p5 = scmp.lt.s32.totalorder (!%p201_p3), %s738_s13, 1  ;;  %p254_p6 = scmp.lt.s32.totalorder (!%p201_p3), %s734_s12, 3 }
   0x9   : > { %s864_s18 = smov (%p34_p4, %s862_s18), 0  ;;  %204 = sbr.rel (%p201_p3) target bundleno = 789 (0x315), region = 32 }
   0xe   : > { %vm294_vm0 = vcmask 64512   ;;  %v752_v0 = vmov 0.0   ;;  %vm753_vm1 = vmmov 0   ;;  %s866_s13 = smov (!%p252_p5, %s738_s13), 1  ;;  %s868_s12 = smov (!%p254_p6, %s734_s12), 3  ;;  %vm291_vm2 = vcmask 7168  }
   0xf   : > { %650 = vmatprep.subr.mxu0 %v752_v0  ;;  %295 = vst.msk [vmem:[#allocation4] sm:$0xff] %vm294_vm0, %v752_v0  ;;  %652 = vmatprep.mubr.msk.f32.mxu0 %vm753_vm1, %v752_v0  ;;  %s633_s19 = sshll.u32 %s866_s13, 2  ;;  %v754_v3 = vmov -inf   ;;  %v755_v7 = vmov 0  }
  0x10   : > { %655 = vmatprep.subr.mxu1 %v752_v0  ;;  %657 = vmatprep.mubr.msk.f32.mxu1 %vm753_vm1, %v752_v0  ;;  %s260_s20 = sadd.s32 %s633_s19, %s868_s12  ;;  %292 = vst.msk [vmem:[#allocation2] sm:$0xff] %vm291_vm2, %v754_v3  ;;  %293 = vst.msk [vmem:[#allocation3] sm:$0xff] %vm291_vm2, %v752_v0 }
  0x11   : > { %s807_s21 = sshll.u32 %s260_s20, 3  ;;  %704 = vset.pattern.permute.xlu0 %v755_v7  ;;  %705 = vset.pattern.permute.xlu1 %v755_v7 }
  0x12   : > { %s270_s24 = scalar_lea.vmem %s852_s1, %s807_s21  ;;  %s262_s27 = scalar_lea.vmem %s851_s0, %s807_s21 }
  0x13   : > { %v296_v1 = vld [vmem:[%s270_s24] sm:$0xff]  ;;  %s278_s30 = scalar_lea.vmem %s853_s2, %s807_s21  ;;  %s289_s6 = scalar_lea.vmem %s854_s3, %s807_s21 }
  0x14   : > { %651 = vmatpush3.xpose.msk.msra.mxu0 %vm294_vm0, %v296_v1  ;;  %v290_v2 = vld [vmem:[%s262_s27] sm:$0xff] }
  0x15   : > { %v297_v12 = vld [vmem:[%s278_s30] sm:$0xff] }
  0x16   : > { %656 = vmatpush3.msra.mxu1 %v297_v12  ;;  %v397_v26 = vld [vmem:[#allocation4] sm:$0xff] }
  0x17   : > { %653 = vmatmul.mubr.msk.f32.vlgmr.msra.gmra.mxu0 %vm294_vm0, %v290_v2  ;;  %v374_v8 = vld [vmem:[#allocation2] sm:$0xff]  ;;  %v390_v20 = vld [vmem:[#allocation3] sm:$0xff] }
  0xd7   : > { %v370_v4 = vpop.f32.mrf.mxu0 }
  0xd8   : > { %v375_v5 = vsel %vm294_vm0, %v370_v4, -inf }
  0xd9   : > { %376 = vmax.xlane.f32.xlu0 %v375_v5  ;;  %v654_v6 = vpop.f32.mrf.mxu0 }
 0x162   : > { %v377_v9 = vpop.xlane.xlu0 %376 }
 0x163   : > { %v378_v10 = vmax.f32 %v374_v8, %v377_v9 }
 0x165   : > { %v379_v11 = vsub.f32 %v374_v8, %v378_v10  ;;  %479 = vst.msk [vmem:[#allocation2] sm:$0xff] %vm291_vm2, %v378_v10  ;;  %384 = vperm.xlu0 %704, %v378_v10  }
 0x167   : > { %v380_v17 = vmul.f32 1.442695, %v379_v11 }
 0x1e0   : > { %v385_v13 = vpop.permute.xlu0 %384 }
 0x1e1   : > { %v387_v14 = vsub.f32 %v370_v4, %v385_v13 }
 0x1e3   : > { %v388_v15 = vmul.f32 1.442695, %v387_v14 }
 0x1e5   : > { %706 = vpow2.f32 %v388_v15 }
 0x1e6   : > { %708 = vpow2.f32 %v380_v17 }
 0x1f2   : > { %v707_v16 = vpop.eup %706 }
 0x1f3   : > { %658 = vmatmul.mubr.msk.f32.vlgmr.msra.gmra.mxu1 %vm294_vm0, %v707_v16  ;;  %v392_v18 = vsel %vm294_vm0, %v707_v16, 0.0  ;;  %v709_v19 = vpop.eup %708 }
 0x1f4   : > { %393 = vadd.xlane.f32.xlu1 %v392_v18  ;;  %v391_v21 = vmul.f32 %v709_v19, %v390_v20 }
 0x205   : > { %400 = vperm.xlu1 %705, %v709_v19  }
 0x27d   : > { %v394_v22 = vpop.xlane.xlu1 %393 }
 0x27e   : > { %v395_v23 = vadd.f32 %v394_v22, %v391_v21 }
 0x280   : > { %396 = vst.msk [vmem:[#allocation3] sm:$0xff] %vm291_vm2, %v395_v23 }
 0x281   : > { %v401_v27 = vpop.permute.xlu1 %400 }
 0x282   : > { %v403_v28 = vmul.f32 %v401_v27, %v397_v26 }
 0x287   : > { %v480_v24 = vld [vmem:[#allocation3] sm:$0xff] }
 0x288   : > { %710 = vrcp.f32 %v480_v24 }
 0x295   : > { %v711_v25 = vpop.eup %710 }
 0x296   : > { %485 = vperm.xlu1 %705, %v711_v25  }
 0x2b3   : > { %v473_v29 = vpop.f32.mrf.mxu1 }
 0x2b4   : > { %v477_v30 = vadd.f32 %v473_v29, %v403_v28 }
 0x2b5   : > { %v659_v31 = vpop.f32.mrf.mxu1 }
 0x2b6   : > { %478 = vst.msk [vmem:[#allocation4] sm:$0xff] %vm294_vm0, %v477_v30 }
 0x2bd   : > { %v482_v32 = vld [vmem:[#allocation4] sm:$0xff] }
 0x311   : > { %v486_v33 = vpop.permute.xlu1 %485 }
 0x312   : > { %v488_v34 = vmul.f32 %v486_v33, %v482_v32 }
 0x314   : > { %489 = vst.msk [vmem:[%s289_s6] sm:$0xff] %vm294_vm0, %v488_v34 }
 0x315 PF: > { %s13_s16 = sadd.s32 1, %s750_s16   ;;  %s855_s12 = smov %s742_s14 }
 0x316   : > { %p10_p7 = scmp.ge.s32.totalorder %s13_s16, 10   ;;  %s856_s13 = smov %s746_s15 }
 0x317   : > { %s857_s14 = smov %s860_s17  ;;  %s858_s15 = smov %s864_s18 }
 0x318   :  { %12 = sbr.rel (!%p10_p7) target bundleno = 3 (0x3), region = 68 }

</bundles_post_ra>
